<compile_context>
chip_gen: v6e
topology: v6e:2x2x1
jax: 0.10.0
libtpu: 0.0.40
codegen_flags: <defaults>
</compile_context>

<pallas_src>
import math

import jax
import jax.numpy as jnp
from jax.experimental import pallas as pl
from jax.experimental.pallas import tpu as pltpu

_MiB = 1024 * 1024
# Below this many input bytes, XLA's fused elementwise beats a kernel launch.
_SMALL_INPUT_BYPASS_BYTES = 256 * 1024
# Slabs at least this big are split into >= 4 grid steps (megacore + overlap).
_MIN_MULTISTEP_BYTES = 1 * _MiB


def _layer_scale_kernel(x_ref, gamma_ref, o_ref):
    # x_ref: (tile_rows, L), gamma_ref: (1, L) -> broadcast multiply on the VPU.
    o_ref[...] = x_ref[...] * gamma_ref[...]


def _vmem_budget():
    """Returns (target_block_bytes, vmem_limit_bytes), generation-aware."""
    try:
        cap = pltpu.get_tpu_info().vmem_capacity_bytes
    except Exception:  # info unavailable -> assume the smallest (v7x-like) VMEM
        cap = 64 * _MiB
    if cap > 64 * _MiB:
        # v5e / v6e: 128 MiB physical VMEM per TensorCore.
        # 2x(in) + 2x(out) double-buffered = 32 MiB, well under the 64 MiB limit.
        return 8 * _MiB, 64 * _MiB
    # v7x: only 64 MiB physical per TensorCore -> 24 MiB double-buffered.
    return 6 * _MiB, 48 * _MiB


def _pick_lane_width(dim, total, sublane):
    """Lane width that is a multiple of both `dim` (gamma tiling stays aligned)
    and 128 (unmasked full-width stores).  Returns None if no reasonable
    lane-dense packing exists for this dim / total."""
    if dim % 128 == 0:
        return dim
    g = math.gcd(dim, 128)
    base = dim * (128 // g)  # lcm(dim, 128)
    if base > 16384 or total < base:
        return None
    lane_width = base
    # Widen toward 1024 lanes while keeping at least `sublane` packed rows.
    while lane_width < 1024 and total >= lane_width * 2 * sublane:
        lane_width *= 2
    return lane_width


def layer_scale(x: jax.Array, gamma: jax.Array, *,
                min_kernel_bytes: int = _SMALL_INPUT_BYPASS_BYTES) -> jax.Array:
    """Applies y = x * gamma, gamma broadcast along the last axis of x."""
    orig_shape = x.shape
    dim = orig_shape[-1]
    assert gamma.shape == (dim,), f"gamma must have shape ({dim},)"

    # Keep the multiply/store in the activation dtype (no f32 upcast traffic).
    gamma = gamma.astype(x.dtype)

    itemsize = jnp.dtype(x.dtype).itemsize
    total = x.size

    # Tiny-input bypass: a single unpipelined grid step is slower than XLA's
    # fused elementwise for a few-KiB tensor.
    if total * itemsize < min_kernel_bytes:
        return x * gamma

    # Sublane packing: 8 rows for 32-bit, 16 for 16-bit, 32 for 8-bit dtypes.
    sublane = max(8, 32 // itemsize)
    target_block_bytes, vmem_limit_bytes = _vmem_budget()

    # --- Lane-dense repacking ------------------------------------------------
    lane_width = _pick_lane_width(dim, total, sublane)
    if lane_width is not None:
        rows = total // lane_width
        n_main = rows * lane_width
        x_flat = x.reshape(-1)
        x2d = x_flat[:n_main].reshape(rows, lane_width)
        gamma2d = jnp.tile(gamma, lane_width // dim).reshape(1, lane_width)
        tail = total - n_main          # < lane_width elems, multiple of dim
    else:
        # Pathological dim (no reasonable lcm packing / too little data):
        # keep channels on lanes; last block dim == full dim so the BlockSpec
        # is legal even when dim isn't a 128-multiple (masked stores possible).
        lane_width = dim
        rows = total // dim
        x_flat = None
        x2d = x.reshape(rows, dim)
        gamma2d = gamma.reshape(1, dim)
        n_main = total
        tail = 0

    # --- Row tile sized for ~target_block_bytes, using PADDED lane width -----
    padded_lane = -(-lane_width // 128) * 128      # VMEM pads lanes to 128
    row_bytes = padded_lane * itemsize
    tile_rows = max(sublane, (target_block_bytes // row_bytes) // sublane * sublane)

    # Guarantee >= 4 grid steps on slabs worth pipelining: both v7x TensorCores
    # get work and DMA prefetch/writeback can overlap compute.
    slab_bytes = rows * row_bytes
    if slab_bytes >= _MIN_MULTISTEP_BYTES and rows >= 4 * sublane:
        tile_rows = min(tile_rows, max(sublane, (rows // 4) // sublane * sublane))

    if tile_rows >= rows:
        tile_rows = rows               # small slab: single full-extent block

    grid = (pl.cdiv(rows, tile_rows),)  # ragged last block handled by Pallas

    cost = pl.CostEstimate(
        flops=rows * lane_width,
        transcendentals=0,
        bytes_accessed=2 * rows * lane_width * itemsize + gamma2d.size * itemsize,
    )

    out2d = pl.pallas_call(
        _layer_scale_kernel,
        out_shape=jax.ShapeDtypeStruct((rows, lane_width), x.dtype),
        grid_spec=pltpu.PrefetchScalarGridSpec(
            num_scalar_prefetch=0,
            grid=grid,
            in_specs=[
                pl.BlockSpec((tile_rows, lane_width), lambda i: (i, 0)),
                # Constant block index -> gamma stays resident in VMEM,
                # no per-step re-DMA.
                pl.BlockSpec((1, lane_width), lambda i: (0, 0)),
            ],
            out_specs=pl.BlockSpec((tile_rows, lane_width), lambda i: (i, 0)),
        ),
        compiler_params=pltpu.CompilerParams(
            dimension_semantics=("parallel",),
            vmem_limit_bytes=vmem_limit_bytes,
        ),
        cost_estimate=cost,
    )(x2d, gamma2d)

    if tail:
        # Tiny tail (< lane_width elements, channel-aligned) in plain jnp.
        tail_out = (x_flat[n_main:].reshape(-1, dim) * gamma).reshape(-1)
        out_flat = jnp.concatenate([out2d.reshape(-1), tail_out])
        return out_flat.reshape(orig_shape)
    return out2d.reshape(orig_shape)


if __name__ == "__main__":
    # Module config: dim=32, init_values=1e-5  (gamma = init_values * ones(dim))
    batch, seq, dim = 2, 8, 32
    init_values = 1e-5

    key = jax.random.PRNGKey(0)
    x = jax.random.normal(key, (batch, seq, dim), dtype=jnp.float32)
    gamma = jnp.full((dim,), init_values, dtype=jnp.float32)

    # min_kernel_bytes=0 -> force the Pallas path even for this tiny test shape
    # (in production the small-input bypass would handle it in plain XLA).
    y = jax.block_until_ready(layer_scale(x, gamma, min_kernel_bytes=0))
    ref = x * gamma
    assert y.shape == x.shape and y.dtype == x.dtype
    assert jnp.allclose(y, ref, atol=1e-7, rtol=1e-6)

    # Mixed dtype: bf16 activations, f32 gamma.
    x2 = jax.random.normal(jax.random.PRNGKey(1), (4, 24, dim), dtype=jnp.bfloat16)
    y2 = jax.block_until_ready(layer_scale(x2, gamma, min_kernel_bytes=0))
    ref2 = (x2.astype(jnp.float32) * gamma).astype(jnp.bfloat16)
    assert y2.shape == x2.shape and y2.dtype == x2.dtype
    assert jnp.allclose(y2.astype(jnp.float32), ref2.astype(jnp.float32),
                        atol=1e-2, rtol=1e-2)

    # Awkward total: exercises the lane-dense slab + jnp tail split.
    x3 = jax.random.normal(jax.random.PRNGKey(2), (3, 5, dim), dtype=jnp.float32)
    y3 = jax.block_until_ready(layer_scale(x3, gamma, min_kernel_bytes=0))
    assert y3.shape == x3.shape and jnp.allclose(y3, x3 * gamma, atol=1e-7, rtol=1e-6)

    # dim that is a multiple of 128 and a slab big enough for a 4-step grid.
    dim4 = 128
    gamma4 = jnp.full((dim4,), init_values, dtype=jnp.float32)
    x4 = jax.random.normal(jax.random.PRNGKey(3), (8, 256, dim4), dtype=jnp.float32)
    y4 = jax.block_until_ready(layer_scale(x4, gamma4, min_kernel_bytes=0))
    assert y4.shape == x4.shape and jnp.allclose(y4, x4 * gamma4, atol=1e-7, rtol=1e-6)

    print("KERNEL_OK")
</pallas_src>

<mosaic_0001>
module attributes {stable_mosaic.version = 11 : i64} {
  func.func @_layer_scale_kernel(%arg0: i32, %arg1: memref<4x128xf32, #tpu.memory_space<vmem>>, %arg2: memref<1x128xf32, #tpu.memory_space<vmem>>, %arg3: memref<4x128xf32, #tpu.memory_space<vmem>>) attributes {dimension_semantics = [#tpu.dimension_semantics<parallel>], iteration_bounds = array<i64: 1>, scalar_prefetch = 0 : i64, scratch_operands = 0 : i64, tpu.core_type = #tpu.core_type<tc>, window_params = [{transform_indices = @transform_0, window_bounds = array<i64: 4, 128>}, {pipeline_mode = #tpu.pipeline_mode<synchronous>, transform_indices = @transform_1, window_bounds = array<i64: 1, 128>}, {transform_indices = @transform_2, window_bounds = array<i64: 4, 128>}]} {
    %c0 = arith.constant 0 : index
    %c0_0 = arith.constant 0 : index
    %0 = vector.load %arg1[%c0, %c0_0] : memref<4x128xf32, #tpu.memory_space<vmem>>, vector<4x128xf32>
    %c0_1 = arith.constant 0 : index
    %c0_2 = arith.constant 0 : index
    %1 = vector.load %arg2[%c0_1, %c0_2] : memref<1x128xf32, #tpu.memory_space<vmem>>, vector<1x128xf32>
    %2 = vector.broadcast %1 : vector<1x128xf32> to vector<4x128xf32>
    %3 = arith.mulf %0, %2 : vector<4x128xf32>
    %c0_3 = arith.constant 0 : index
    %c0_4 = arith.constant 0 : index
    %4 = vector.load %arg3[%c0_3, %c0_4] : memref<4x128xf32, #tpu.memory_space<vmem>>, vector<4x128xf32>
    tpu.vector_store %arg3[%c0_3, %c0_4], %3 {strides = array<i32>} : memref<4x128xf32, #tpu.memory_space<vmem>>, vector<4x128xf32>,
    return
  }
  func.func @transform_0(%arg0: i32) -> (i32, i32) {
    %c0_i32 = arith.constant 0 : i32
    %c0_i32_0 = arith.constant 0 : i32
    return %arg0, %c0_i32 : i32, i32
  }
  func.func @transform_1(%arg0: i32) -> (i32, i32) {
    %c0_i32 = arith.constant 0 : i32
    %c0_i32_0 = arith.constant 0 : i32
    %c0_i32_1 = arith.constant 0 : i32
    return %c0_i32, %c0_i32_0 : i32, i32
  }
  func.func @transform_2(%arg0: i32) -> (i32, i32) {
    %c0_i32 = arith.constant 0 : i32
    %c0_i32_0 = arith.constant 0 : i32
    return %arg0, %c0_i32 : i32, i32
  }
}

</mosaic_0001>

<bundles_post_ra>
// kernel: tpu_custom_call.1
= control target key start
LH: loop header
LB: loop body
LE: loop exit
PB: predicated region body
PF: predicated region fallthrough
CT: control target
= control target key end

     0   :  { %7 = vsyncpa [#allocation3], 0  ;;  %s122_s0 = inlined_call_operand.hbm [shape: f32[4,128], index: 0, kind: input, shape index: {}]   ;;  %s123_s1 = inlined_call_operand.vmem [shape: f32[1,128], index: 1, kind: input, shape index: {}]   ;;  %s124_s2 = inlined_call_operand.hbm [shape: f32[4,128], index: 2, kind: output, shape index: {}]  }
   0x1   :  { %8 = vsyncpa [#allocation4], 0  ;;  %s96_s9 = smov [#allocation2]  }
   0x2   :  { %s15_s10 = sshll.u32 %s96_s9, 4  ;;  %s16_s10 = int_to_ptr.vmem [resolvable:$true] %s15_s10 }
   0x3   :  { %s60_s11 = scalar_lea.vmem %s16_s10, 64  ;;  %p65_p1 = scmp.lt.s32.totalorder %s16_s10, %s16_s10 }
   0x4   :  { %p61_p0 = scmp.ne.s32.totalorder %s16_s10, %s60_s11  ;;  %p66_p2 = scmp.lt.s32.totalorder %s60_s11, %s60_s11 }
   0x6   :  { %p67_p3 = por %p66_p2, %p65_p1 }
   0x8   :  { %p68_p4 = pnand %p67_p3, %p61_p0 }
   0xa   :  { %71 = shalt.err (!%p68_p4)
}
   0xb   :  { %18 = dma.hbm_to_vmem [thread:$0]  %s122_s0, 64, %s16_s10, [#allocation3]  }
   0xc   :  { %92 = dma.done.wait [#allocation3], 64  }
   0xd   :  { %93 = vsyncadd [#allocation3], 4294967232  ;;  %s97_s14 = smov [#allocation5]   ;;  %v24_v0 = vld [vmem:[#allocation2] sm:$0xf] }
   0xe   :  { %s40_s15 = sshll.u32 %s97_s14, 4  ;;  %v49_v1 = vld [vmem:[%s123_s1] ss:$0 sm:$0xff]  ;;  %s41_s15 = int_to_ptr.vmem [resolvable:$true] %s40_s15 }
   0xf   :  { %v32_v2 = vmul.f32 %v49_v1, %v24_v0  ;;  %s72_s18 = scalar_lea.vmem %s41_s15, 64  ;;  %p77_p6 = scmp.lt.s32.totalorder %s41_s15, %s41_s15 }
  0x10   :  { %p73_p5 = scmp.ne.s32.totalorder %s41_s15, %s72_s18  ;;  %p78_p7 = scmp.lt.s32.totalorder %s72_s18, %s72_s18 }
  0x11   :  { %33 = vst [vmem:[#allocation5] sm:$0xf] %v32_v2 }
  0x12   :  { %p79_p8 = por %p78_p7, %p77_p6 }
  0x14   :  { %p80_p9 = pnand %p79_p8, %p73_p5 }
  0x16   :  { %83 = shalt.err (!%p80_p9)
}
  0x17   :  { %43 = dma.vmem_to_hbm [thread:$0]  %s41_s15, 64, %s124_s2, [#allocation4]  }
  0x18   :  { %94 = dma.done.wait [#allocation4], 64  }
  0x19   :  { %95 = vsyncadd [#allocation4], 4294967232 }
  0x1a   :  { %47 = vsyncpa [#allocation3], 1 }
  0x1b   :  { %48 = vsyncpa [#allocation4], 1 }

</bundles_post_ra>
